<compile_context>
chip_gen: v6e
topology: v6e:2x2x1
jax: 0.10.0
libtpu: 0.0.40
codegen_flags: <defaults>
</compile_context>

<pallas_src>
from functools import partial

import jax
import jax.numpy as jnp
from jax import lax
from jax.experimental import pallas as pl
from jax.experimental.pallas import tpu as pltpu

BN_EPS = 1e-5
_VMEM_LIMIT_BYTES = 48 * 1024 * 1024   # < v7x 64 MiB physical, >> default scoped


def _round_up(v, m):
    return ((v + m - 1) // m) * m


def _pick_row_tile(B, N, target):
    """Row tile that never straddles a partial batch (multiple or divisor of N)."""
    rows = B * N
    if rows <= target:
        return rows
    if N <= target:                              # tile spans whole batches
        ks = [k for k in range(1, B + 1) if B % k == 0 and k * N <= target]
        good = [k for k in ks if (k * N) % 8 == 0]
        return (max(good) if good else max(ks)) * N
    divs = [t for t in range(1, target + 1) if N % t == 0]
    good = [t for t in divs if t % 8 == 0]
    # TODO(synk): awkward (e.g. prime) N would need row padding + masked per-batch max.
    return max(good) if good else max(divs)


def _pick_stat_slots(nt, tpb):
    """2 partial-stat slots (v7x dual TC) when tiles split evenly on batch bounds."""
    if nt % 2 == 0 and (nt // 2) % tpb == 0:
        return 2
    return 1


# ---------------------------------------------------------------------------
# kernels
# ---------------------------------------------------------------------------
def _l1_kernel(x_ref, w_ref, z_ref, sum_ref, sq_ref):
    """Layer 1: row-tiled matmul + BN batch-stat accumulation (no bias)."""
    @pl.when(pl.program_id(1) == 0)
    def _():
        sum_ref[...] = jnp.zeros_like(sum_ref)
        sq_ref[...] = jnp.zeros_like(sq_ref)

    z = jnp.dot(x_ref[...], w_ref[...], preferred_element_type=jnp.float32)
    z_ref[...] = z.astype(z_ref.dtype)
    sum_ref[...] += jnp.sum(z, axis=0, keepdims=True)
    sq_ref[...] += jnp.sum(z * z, axis=0, keepdims=True)


def _bn_prev(inv_n, sum_in_ref, sq_in_ref, g_ref, be_ref, zin_ref):
    """BN(prev layer, folded per-channel FMA) + ReLU of the current row tile."""
    sin = jnp.sum(sum_in_ref[...], axis=0)          # combine S partial slots
    qin = jnp.sum(sq_in_ref[...], axis=0)
    mean = sin * inv_n
    var = jnp.maximum(qin * inv_n - mean * mean, 0.0)
    s = g_ref[...] * lax.rsqrt(var + BN_EPS)
    t = be_ref[...] - mean * s
    return jnp.maximum(zin_ref[...].astype(jnp.float32) * s + t, 0.0)


def _mid_kernel(inv_ref, zin_ref, sum_in_ref, sq_in_ref, g_ref, be_ref, w_ref,
                z_ref, sum_ref, sq_ref):
    """Layers 2..3: BN(prev)+ReLU folded into this layer's matmul + stats."""
    @pl.when(pl.program_id(1) == 0)
    def _():
        sum_ref[...] = jnp.zeros_like(sum_ref)
        sq_ref[...] = jnp.zeros_like(sq_ref)

    h = _bn_prev(inv_ref[0, 0], sum_in_ref, sq_in_ref, g_ref, be_ref, zin_ref)
    z = jnp.dot(h.astype(w_ref.dtype), w_ref[...],
                preferred_element_type=jnp.float32)
    z_ref[...] = z.astype(z_ref.dtype)
    sum_ref[...] += jnp.sum(z, axis=0, keepdims=True)
    sq_ref[...] += jnp.sum(z * z, axis=0, keepdims=True)


def _l4_kernel(nb, tpb, inv_ref, zin_ref, sum_in_ref, sq_in_ref, g_ref, be_ref,
               w_ref, sum_ref, sq_ref, zmax_ref, zmin_ref):
    """Layer 4: like _mid_kernel but z4 is never written to HBM; instead
    accumulate per-batch per-channel running max/min of raw z4."""
    @pl.when(pl.program_id(1) == 0)
    def _():
        sum_ref[...] = jnp.zeros_like(sum_ref)
        sq_ref[...] = jnp.zeros_like(sq_ref)

    h = _bn_prev(inv_ref[0, 0], sum_in_ref, sq_in_ref, g_ref, be_ref, zin_ref)
    z = jnp.dot(h.astype(w_ref.dtype), w_ref[...],
                preferred_element_type=jnp.float32)
    sum_ref[...] += jnp.sum(z, axis=0, keepdims=True)
    sq_ref[...] += jnp.sum(z * z, axis=0, keepdims=True)

    # per-(sub)batch max/min of raw z4 (BN affine + relu applied in the head)
    zb = z.reshape(nb, -1, z.shape[-1])
    tmax = jnp.max(zb, axis=1)
    tmin = jnp.min(zb, axis=1)
    if tpb == 1:                       # tile contains nb whole batches: assign
        zmax_ref[...] = tmax
        zmin_ref[...] = tmin
    else:                              # several tiles per batch: accumulate
        @pl.when(pl.program_id(1) % tpb == 0)
        def _():
            zmax_ref[...] = tmax
            zmin_ref[...] = tmin

        @pl.when(pl.program_id(1) % tpb != 0)
        def _():
            zmax_ref[...] = jnp.maximum(zmax_ref[...], tmax)
            zmin_ref[...] = jnp.minimum(zmin_ref[...], tmin)


def _head_kernel(inv_ref, sum_ref, sq_ref, g_ref, be_ref, zmax_ref, zmin_ref,
                 y_ref, wfx_ref, wfy_ref, bf_ref, out_ref):
    """BN+ReLU of layer-4 max/min, per-batch feature, fused fc1|fc2."""
    inv_n = inv_ref[0, 0]
    sin = jnp.sum(sum_ref[...], axis=0)
    qin = jnp.sum(sq_ref[...], axis=0)
    mean = sin * inv_n
    var = jnp.maximum(qin * inv_n - mean * mean, 0.0)
    s = g_ref[...] * lax.rsqrt(var + BN_EPS)
    t = be_ref[...] - mean * s
    # max_n relu(s*z_n+t) == relu(max(s*zmax+t, s*zmin+t))  (handles s<0 too)
    feat = jnp.maximum(
        jnp.maximum(zmax_ref[...] * s + t, zmin_ref[...] * s + t), 0.0)
    # cat([feat, y]) @ W == feat @ W_feat + y @ W_y   (weights pre-split+fused)
    out_ref[...] = (
        jnp.dot(feat, wfx_ref[...], preferred_element_type=jnp.float32)
        + jnp.dot(y_ref[...], wfy_ref[...], preferred_element_type=jnp.float32)
        + bf_ref[...])


# ---------------------------------------------------------------------------
# pallas_call wrappers
# ---------------------------------------------------------------------------
def _conv_params():
    return pltpu.CompilerParams(
        dimension_semantics=("parallel", "arbitrary"),
        vmem_limit_bytes=_VMEM_LIMIT_BYTES)


def _layer1_pass(x2d, w, T, S, act_dtype):
    rows, c_in = x2d.shape
    c_out = w.shape[1]
    nps = (rows // T) // S
    row_map = lambda c, i: (c * nps + i, 0)
    stat_map = lambda c, i: (c, 0, 0)
    rep2 = lambda c, i: (0, 0)
    return pl.pallas_call(
        _l1_kernel,
        grid=(S, nps),
        in_specs=[pl.BlockSpec((T, c_in), row_map),
                  pl.BlockSpec((c_in, c_out), rep2)],
        out_specs=(pl.BlockSpec((T, c_out), row_map),
                   pl.BlockSpec((None, 1, c_out), stat_map),
                   pl.BlockSpec((None, 1, c_out), stat_map)),
        out_shape=(jax.ShapeDtypeStruct((rows, c_out), act_dtype),
                   jax.ShapeDtypeStruct((S, 1, c_out), jnp.float32),
                   jax.ShapeDtypeStruct((S, 1, c_out), jnp.float32)),
        compiler_params=_conv_params(),
    )(x2d, w)


def _mid_pass(inv_n, zin, sum_in, sq_in, g, be, w, T, S, act_dtype):
    rows, c_in = zin.shape
    c_out = w.shape[1]
    s_in = sum_in.shape[0]
    nps = (rows // T) // S
    row_map = lambda c, i: (c * nps + i, 0)
    stat_map = lambda c, i: (c, 0, 0)
    rep2 = lambda c, i: (0, 0)
    rep3 = lambda c, i: (0, 0, 0)
    return pl.pallas_call(
        _mid_kernel,
        grid=(S, nps),
        in_specs=[pl.BlockSpec(memory_space=pltpu.MemorySpace.SMEM),   # inv_n
                  pl.BlockSpec((T, c_in), row_map),
                  pl.BlockSpec((s_in, 1, c_in), rep3),
                  pl.BlockSpec((s_in, 1, c_in), rep3),
                  pl.BlockSpec((1, c_in), rep2),
                  pl.BlockSpec((1, c_in), rep2),
                  pl.BlockSpec((c_in, c_out), rep2)],
        out_specs=(pl.BlockSpec((T, c_out), row_map),
                   pl.BlockSpec((None, 1, c_out), stat_map),
                   pl.BlockSpec((None, 1, c_out), stat_map)),
        out_shape=(jax.ShapeDtypeStruct((rows, c_out), act_dtype),
                   jax.ShapeDtypeStruct((S, 1, c_out), jnp.float32),
                   jax.ShapeDtypeStruct((S, 1, c_out), jnp.float32)),
        compiler_params=_conv_params(),
    )(inv_n, zin, sum_in, sq_in, g, be, w)


def _last_pass(inv_n, zin, sum_in, sq_in, g, be, w, T, S, nb, tpb):
    rows, c_in = zin.shape
    c_out = w.shape[1]
    s_in = sum_in.shape[0]
    nt = rows // T
    nps = nt // S
    n_bblk = nt // tpb                      # batch blocks: (B // nb)
    row_map = lambda c, i: (c * nps + i, 0)
    stat_map = lambda c, i: (c, 0, 0)
    batch_map = lambda c, i: ((c * nps + i) // tpb, 0, 0)
    rep2 = lambda c, i: (0, 0)
    rep3 = lambda c, i: (0, 0, 0)
    return pl.pallas_call(
        partial(_l4_kernel, nb, tpb),
        grid=(S, nps),
        in_specs=[pl.BlockSpec(memory_space=pltpu.MemorySpace.SMEM),   # inv_n
                  pl.BlockSpec((T, c_in), row_map),
                  pl.BlockSpec((s_in, 1, c_in), rep3),
                  pl.BlockSpec((s_in, 1, c_in), rep3),
                  pl.BlockSpec((1, c_in), rep2),
                  pl.BlockSpec((1, c_in), rep2),
                  pl.BlockSpec((c_in, c_out), rep2)],
        out_specs=(pl.BlockSpec((None, 1, c_out), stat_map),
                   pl.BlockSpec((None, 1, c_out), stat_map),
                   pl.BlockSpec((None, nb, c_out), batch_map),
                   pl.BlockSpec((None, nb, c_out), batch_map)),
        out_shape=(jax.ShapeDtypeStruct((S, 1, c_out), jnp.float32),
                   jax.ShapeDtypeStruct((S, 1, c_out), jnp.float32),
                   jax.ShapeDtypeStruct((n_bblk, nb, c_out), jnp.float32),
                   jax.ShapeDtypeStruct((n_bblk, nb, c_out), jnp.float32)),
        compiler_params=_conv_params(),
    )(inv_n, zin, sum_in, sq_in, g, be, w)


def _head_pass(inv_n, ssum, ssq, g, be, zmax, zmin, y, wfx, wfy, bf):
    B, c4 = zmax.shape
    s_in = ssum.shape[0]
    y_dim = y.shape[1]
    out_pad = wfx.shape[1]
    full2 = lambda i: (0, 0)
    full3 = lambda i: (0, 0, 0)
    return pl.pallas_call(
        _head_kernel,
        grid=(1,),
        in_specs=[pl.BlockSpec(memory_space=pltpu.MemorySpace.SMEM),
                  pl.BlockSpec((s_in, 1, c4), full3),
                  pl.BlockSpec((s_in, 1, c4), full3),
                  pl.BlockSpec((1, c4), full2),
                  pl.BlockSpec((1, c4), full2),
                  pl.BlockSpec((B, c4), full2),
                  pl.BlockSpec((B, c4), full2),
                  pl.BlockSpec((B, y_dim), full2),
                  pl.BlockSpec((c4, out_pad), full2),
                  pl.BlockSpec((y_dim, out_pad), full2),
                  pl.BlockSpec((1, out_pad), full2)],
        out_specs=pl.BlockSpec((B, out_pad), full2),
        out_shape=jax.ShapeDtypeStruct((B, out_pad), jnp.float32),
    )(inv_n, ssum, ssq, g, be, zmax, zmin, y, wfx, wfy, bf)


# ---------------------------------------------------------------------------
# params (one-time prep) + forward wrapper
# ---------------------------------------------------------------------------
def prepare_params(params, input_channels, latent_size, act_dtype=jnp.bfloat16):
    """One-time padding / casting / fc1|fc2 fusion (hoisted out of the forward)."""
    conv = params["conv"]
    dims = [input_channels] + [w.shape[1] for (w, _b, _g, _be) in conv]
    c_in_pad = _round_up(input_channels, 8)
    w_p, g_p, be_p = [], [], []
    for k, (w, _b, g, be) in enumerate(conv):
        # conv biases dropped: cancelled exactly by train-mode BN mean subtraction.
        cin = c_in_pad if k == 0 else dims[k]
        wp = jnp.zeros((cin, dims[k + 1]), jnp.float32).at[:dims[k], :].set(w)
        w_p.append(wp.astype(act_dtype))
        g_p.append(jnp.asarray(g, jnp.float32).reshape(1, -1))
        be_p.append(jnp.asarray(be, jnp.float32).reshape(1, -1))

    fe_out = dims[4]
    L = latent_size
    (wf1, bf1), (wf2, bf2) = params["fc1"], params["fc2"]
    y_dim = wf1.shape[0] - fe_out
    out_pad = _round_up(2 * L, 128)          # lane-dense fused mu|logvar output
    wfx = jnp.zeros((fe_out, out_pad), jnp.float32)
    wfx = wfx.at[:, :L].set(wf1[:fe_out]).at[:, L:2 * L].set(wf2[:fe_out])
    wfy = jnp.zeros((y_dim, out_pad), jnp.float32)
    wfy = wfy.at[:, :L].set(wf1[fe_out:]).at[:, L:2 * L].set(wf2[fe_out:])
    bf = jnp.zeros((1, out_pad), jnp.float32)
    bf = bf.at[:, :L].set(bf1.reshape(1, L)).at[:, L:2 * L].set(bf2.reshape(1, L))
    return {"dims": dims, "c_in_pad": c_in_pad, "latent": L, "out_pad": out_pad,
            "act_dtype": act_dtype, "w": w_p, "gamma": g_p, "beta": be_p,
            "wfx": wfx, "wfy": wfy, "bf": bf}


def encoder_xy_forward(x_ncn, y, prep, row_tile_target=2048):
    """x_ncn: (B, C_in, N) float32 (PyTorch Conv1d layout); y: (B, 8)."""
    B, C_in, N = x_ncn.shape
    rows = B * N
    dims = prep["dims"]
    act_dtype = prep["act_dtype"]
    assert C_in == dims[0]

    inv_n = jnp.full((1, 1), 1.0 / float(rows), jnp.float32)   # SMEM scalar

    # points-major, channels on the 128-lane axis
    x2d = jnp.transpose(x_ncn, (0, 2, 1)).reshape(rows, C_in)
    x2d = jnp.pad(x2d, ((0, 0), (0, prep["c_in_pad"] - C_in))).astype(act_dtype)

    T = _pick_row_tile(B, N, row_tile_target)
    assert rows % T == 0
    nt = rows // T
    nb = max(T // N, 1)        # whole batches per tile (>=1) ...
    tpb = max(N // T, 1)       # ... or tiles per batch (>=1); one of them is 1
    S = _pick_stat_slots(nt, tpb)

    # layer 1: matmul + stat accumulation (two-phase BN, phase 1)
    z, ssum, ssq = _layer1_pass(x2d, prep["w"][0], T, S, act_dtype)
    # layers 2..3: previous layer's BN+ReLU folded into this layer's matmul
    for k in (1, 2):
        z, ssum, ssq = _mid_pass(inv_n, z, ssum, ssq, prep["gamma"][k - 1],
                                 prep["beta"][k - 1], prep["w"][k], T, S, act_dtype)
    # layer 4: no z4 writeback; accumulate per-batch max/min of raw z4 instead
    ssum, ssq, zmax, zmin = _last_pass(inv_n, z, ssum, ssq, prep["gamma"][2],
                                       prep["beta"][2], prep["w"][3], T, S, nb, tpb)
    zmax = zmax.reshape(B, dims[4])
    zmin = zmin.reshape(B, dims[4])

    out = _head_pass(inv_n, ssum, ssq, prep["gamma"][3], prep["beta"][3],
                     zmax, zmin, y, prep["wfx"], prep["wfy"], prep["bf"])

    L = prep["latent"]
    mu = out[:, :L]
    logvar = out[:, L:2 * L]
    # TODO(synk): torch.distributions Independent(Normal(...)) has no array
    # equivalent; return its parameters (mu, logvar, scale) instead.
    scale = jnp.exp(logvar) + 3e-22
    return mu, logvar, scale


# ---------------------------------------------------------------------------
# param init + pure-JAX reference
# ---------------------------------------------------------------------------
def init_params(key, input_channels, x_mult=1, latent_size=3):
    """PyTorch-style U[-1/sqrt(fan_in), 1/sqrt(fan_in)] init (incl. conv bias)."""
    fe_out = 512 * x_mult
    dims = [input_channels, 64 * x_mult, 128 * x_mult, 256 * x_mult, fe_out]
    keys = iter(jax.random.split(key, 12))
    conv = []
    for i in range(4):
        fan_in, fan_out = dims[i], dims[i + 1]
        bound = float(fan_in) ** -0.5
        w = jax.random.uniform(next(keys), (fan_in, fan_out), jnp.float32, -bound, bound)
        b = jax.random.uniform(next(keys), (1, fan_out), jnp.float32, -bound, bound)
        conv.append((w, b, jnp.ones((1, fan_out), jnp.float32),
                     jnp.zeros((1, fan_out), jnp.float32)))
    fc_in = fe_out + 8
    fcs = []
    for _ in range(2):  # fc1 (mu), fc2 (logvar)
        bound = float(fc_in) ** -0.5
        w = jax.random.uniform(next(keys), (fc_in, latent_size), jnp.float32, -bound, bound)
        b = jax.random.uniform(next(keys), (1, latent_size), jnp.float32, -bound, bound)
        fcs.append((w, b))
    return {"conv": conv, "fc1": fcs[0], "fc2": fcs[1]}


def reference_forward(x_ncn, y, params, latent_size):
    """Pure-JAX reference (with conv biases + two-pass BN) for correctness."""
    B, C_in, N = x_ncn.shape
    h = jnp.transpose(x_ncn, (0, 2, 1)).reshape(B * N, C_in)
    for (w, b, g, be) in params["conv"]:
        z = h @ w + b
        mean = jnp.mean(z, axis=0, keepdims=True)
        var = jnp.mean((z - mean) ** 2, axis=0, keepdims=True)
        h = jnp.maximum(g * (z - mean) * lax.rsqrt(var + BN_EPS) + be, 0.0)
    feat = jnp.max(h.reshape(B, N, -1), axis=1)
    cat = jnp.concatenate([feat, y], axis=1)
    (wf1, bf1), (wf2, bf2) = params["fc1"], params["fc2"]
    return cat @ wf1 + bf1, cat @ wf2 + bf2


if __name__ == "__main__":
    B, C_in, N = 2, 4, 16          # batch, input point features, num points
    x_mult, latent = 1, 3          # Encoder_xy(input_channels=4, x=1, latent_size=3)

    key = jax.random.PRNGKey(0)
    kx, ky, kp = jax.random.split(key, 3)
    x = jax.random.normal(kx, (B, C_in, N), jnp.float32)   # Conv1d layout (B, C, N)
    y = jax.random.normal(ky, (B, 8), jnp.float32)
    params = init_params(kp, C_in, x_mult, latent)
    mu_ref, lv_ref = reference_forward(x, y, params, latent)

    # --- f32 path: bit-faithful check -------------------------------------
    prep32 = prepare_params(params, C_in, latent, act_dtype=jnp.float32)
    mu, logvar, scale = encoder_xy_forward(x, y, prep32)
    jax.block_until_ready((mu, logvar, scale))
    assert mu.shape == (B, latent) and logvar.shape == (B, latent)
    assert jnp.allclose(mu, mu_ref, atol=1e-4, rtol=1e-4)
    assert jnp.allclose(logvar, lv_ref, atol=1e-4, rtol=1e-4)
    assert bool(jnp.all(jnp.isfinite(scale)))

    # --- bf16 (default perf) path: coarse sanity bound --------------------
    prepbf = prepare_params(params, C_in, latent)           # bf16 acts + weights
    mu_b, lv_b, scale_b = encoder_xy_forward(x, y, prepbf)
    jax.block_until_ready((mu_b, lv_b, scale_b))
    assert float(jnp.max(jnp.abs(mu_b - mu_ref))) < 0.25
    assert float(jnp.max(jnp.abs(lv_b - lv_ref))) < 0.25
    assert bool(jnp.all(jnp.isfinite(scale_b)))

    # --- exercise multi-tile, 2-slot stats, case A (whole batches per tile) ---
    B2, N2 = 4, 64
    x2 = jax.random.normal(jax.random.PRNGKey(1), (B2, C_in, N2), jnp.float32)
    y2 = jax.random.normal(jax.random.PRNGKey(2), (B2, 8), jnp.float32)
    mu2, lv2, _ = encoder_xy_forward(x2, y2, prep32, row_tile_target=128)
    mu2_ref, lv2_ref = reference_forward(x2, y2, params, latent)
    jax.block_until_ready((mu2, lv2))
    assert jnp.allclose(mu2, mu2_ref, atol=1e-3, rtol=1e-3)
    assert jnp.allclose(lv2, lv2_ref, atol=1e-3, rtol=1e-3)

    # --- exercise case B (several tiles per batch, running max/min accum) ---
    B3, N3 = 2, 128
    x3 = jax.random.normal(jax.random.PRNGKey(3), (B3, C_in, N3), jnp.float32)
    y3 = jax.random.normal(jax.random.PRNGKey(4), (B3, 8), jnp.float32)
    mu3, lv3, _ = encoder_xy_forward(x3, y3, prep32, row_tile_target=32)
    mu3_ref, lv3_ref = reference_forward(x3, y3, params, latent)
    jax.block_until_ready((mu3, lv3))
    assert jnp.allclose(mu3, mu3_ref, atol=1e-3, rtol=1e-3)
    assert jnp.allclose(lv3, lv3_ref, atol=1e-3, rtol=1e-3)

    print("KERNEL_OK")
</pallas_src>

<mosaic_0001>
module attributes {stable_mosaic.version = 11 : i64} {
  func.func @_l1_kernel(%arg0: i32, %arg1: i32, %arg2: memref<32x8xf32, #tpu.memory_space<vmem>>, %arg3: memref<8x64xf32, #tpu.memory_space<vmem>>, %arg4: memref<32x64xf32, #tpu.memory_space<vmem>>, %arg5: memref<1x1x64xf32, #tpu.memory_space<vmem>>, %arg6: memref<1x1x64xf32, #tpu.memory_space<vmem>>) attributes {dimension_semantics = [#tpu.dimension_semantics<parallel>, #tpu.dimension_semantics<arbitrary>], iteration_bounds = array<i64: 1, 1>, scalar_prefetch = 0 : i64, scratch_operands = 0 : i64, tpu.core_type = #tpu.core_type<tc>, window_params = [{transform_indices = @transform_0, window_bounds = array<i64: 32, 8>}, {pipeline_mode = #tpu.pipeline_mode<synchronous>, transform_indices = @transform_1, window_bounds = array<i64: 8, 64>}, {transform_indices = @transform_2, window_bounds = array<i64: 32, 64>}, {transform_indices = @transform_3, window_bounds = array<i64: 1, 1, 64>}, {transform_indices = @transform_4, window_bounds = array<i64: 1, 1, 64>}]} {
    %c0_i32 = arith.constant 0 : i32
    %0 = arith.cmpi eq, %arg1, %c0_i32 : i32
    %1 = arith.extui %0 : i1 to i32
    %c0_i32_0 = arith.constant 0 : i32
    %2 = arith.cmpi ne, %1, %c0_i32_0 : i32
    scf.if %2 {
      %cst_20 = arith.constant 0.000000e+00 : f32
      %24 = vector.broadcast %cst_20 : f32 to vector<1x64xf32>
      %c0_21 = arith.constant 0 : index
      %c0_22 = arith.constant 0 : index
      %c0_23 = arith.constant 0 : index
      %25 = vector.load %arg5[%c0_21, %c0_22, %c0_23] : memref<1x1x64xf32, #tpu.memory_space<vmem>>, vector<1x1x64xf32>
      %26 = vector.shape_cast %25 : vector<1x1x64xf32> to vector<1x64xf32>
      %27 = vector.shape_cast %24 : vector<1x64xf32> to vector<1x1x64xf32>
      tpu.vector_store %arg5[%c0_21, %c0_22, %c0_23], %27 {strides = array<i32>} : memref<1x1x64xf32, #tpu.memory_space<vmem>>, vector<1x1x64xf32>,
      %cst_24 = arith.constant 0.000000e+00 : f32
      %28 = vector.broadcast %cst_24 : f32 to vector<1x64xf32>
      %c0_25 = arith.constant 0 : index
      %c0_26 = arith.constant 0 : index
      %c0_27 = arith.constant 0 : index
      %29 = vector.load %arg6[%c0_25, %c0_26, %c0_27] : memref<1x1x64xf32, #tpu.memory_space<vmem>>, vector<1x1x64xf32>
      %30 = vector.shape_cast %29 : vector<1x1x64xf32> to vector<1x64xf32>
      %31 = vector.shape_cast %28 : vector<1x64xf32> to vector<1x1x64xf32>
      tpu.vector_store %arg6[%c0_25, %c0_26, %c0_27], %31 {strides = array<i32>} : memref<1x1x64xf32, #tpu.memory_space<vmem>>, vector<1x1x64xf32>,
    } else {
    }
    %c0 = arith.constant 0 : index
    %c0_1 = arith.constant 0 : index
    %3 = vector.load %arg2[%c0, %c0_1] : memref<32x8xf32, #tpu.memory_space<vmem>>, vector<32x8xf32>
    %c0_2 = arith.constant 0 : index
    %c0_3 = arith.constant 0 : index
    %4 = vector.load %arg3[%c0_2, %c0_3] : memref<8x64xf32, #tpu.memory_space<vmem>>, vector<8x64xf32>
    %cst = arith.constant dense<0.000000e+00> : vector<32x64xf32>
    %5 = tpu.matmul %3, %4, %cst {dimension_numbers = #tpu.dot_dimension_numbers<[1], [0], [0], [1], [0, 0, 1, 1], [], []>} : vector<32x8xf32>, vector<8x64xf32>, vector<32x64xf32> -> vector<32x64xf32>
    %c0_4 = arith.constant 0 : index
    %c0_5 = arith.constant 0 : index
    %6 = vector.load %arg4[%c0_4, %c0_5] : memref<32x64xf32, #tpu.memory_space<vmem>>, vector<32x64xf32>
    tpu.vector_store %arg4[%c0_4, %c0_5], %5 {strides = array<i32>} : memref<32x64xf32, #tpu.memory_space<vmem>>, vector<32x64xf32>,
    %c0_6 = arith.constant 0 : index
    %c0_7 = arith.constant 0 : index
    %c0_8 = arith.constant 0 : index
    %7 = vector.load %arg5[%c0_6, %c0_7, %c0_8] : memref<1x1x64xf32, #tpu.memory_space<vmem>>, vector<1x1x64xf32>
    %8 = vector.shape_cast %7 : vector<1x1x64xf32> to vector<1x64xf32>
    %cst_9 = arith.constant dense<0.000000e+00> : vector<64xf32>
    %9 = vector.multi_reduction <add>, %5, %cst_9 [0] : vector<32x64xf32> to vector<64xf32>
    %10 = vector.shape_cast %9 : vector<64xf32> to vector<1x64xf32>
    %11 = arith.addf %8, %10 : vector<1x64xf32>
    %c0_10 = arith.constant 0 : index
    %c0_11 = arith.constant 0 : index
    %c0_12 = arith.constant 0 : index
    %12 = vector.load %arg5[%c0_10, %c0_11, %c0_12] : memref<1x1x64xf32, #tpu.memory_space<vmem>>, vector<1x1x64xf32>
    %13 = vector.shape_cast %12 : vector<1x1x64xf32> to vector<1x64xf32>
    %14 = vector.shape_cast %11 : vector<1x64xf32> to vector<1x1x64xf32>
    tpu.vector_store %arg5[%c0_10, %c0_11, %c0_12], %14 {strides = array<i32>} : memref<1x1x64xf32, #tpu.memory_space<vmem>>, vector<1x1x64xf32>,
    %c0_13 = arith.constant 0 : index
    %c0_14 = arith.constant 0 : index
    %c0_15 = arith.constant 0 : index
    %15 = vector.load %arg6[%c0_13, %c0_14, %c0_15] : memref<1x1x64xf32, #tpu.memory_space<vmem>>, vector<1x1x64xf32>
    %16 = vector.shape_cast %15 : vector<1x1x64xf32> to vector<1x64xf32>
    %17 = arith.mulf %5, %5 : vector<32x64xf32>
    %cst_16 = arith.constant dense<0.000000e+00> : vector<64xf32>
    %18 = vector.multi_reduction <add>, %17, %cst_16 [0] : vector<32x64xf32> to vector<64xf32>
    %19 = vector.shape_cast %18 : vector<64xf32> to vector<1x64xf32>
    %20 = arith.addf %16, %19 : vector<1x64xf32>
    %c0_17 = arith.constant 0 : index
    %c0_18 = arith.constant 0 : index
    %c0_19 = arith.constant 0 : index
    %21 = vector.load %arg6[%c0_17, %c0_18, %c0_19] : memref<1x1x64xf32, #tpu.memory_space<vmem>>, vector<1x1x64xf32>
    %22 = vector.shape_cast %21 : vector<1x1x64xf32> to vector<1x64xf32>
    %23 = vector.shape_cast %20 : vector<1x64xf32> to vector<1x1x64xf32>
    tpu.vector_store %arg6[%c0_17, %c0_18, %c0_19], %23 {strides = array<i32>} : memref<1x1x64xf32, #tpu.memory_space<vmem>>, vector<1x1x64xf32>,
    return
  }
  func.func @transform_0(%arg0: i32, %arg1: i32) -> (i32, i32) {
    %c1_i32 = arith.constant 1 : i32
    %0 = arith.muli %arg0, %c1_i32 : i32
    %1 = arith.addi %0, %arg1 : i32
    %c0_i32 = arith.constant 0 : i32
    %c0_i32_0 = arith.constant 0 : i32
    return %1, %c0_i32 : i32, i32
  }
  func.func @transform_1(%arg0: i32, %arg1: i32) -> (i32, i32) {
    %c0_i32 = arith.constant 0 : i32
    %c0_i32_0 = arith.constant 0 : i32
    %c0_i32_1 = arith.constant 0 : i32
    return %c0_i32, %c0_i32_0 : i32, i32
  }
  func.func @transform_2(%arg0: i32, %arg1: i32) -> (i32, i32) {
    %c1_i32 = arith.constant 1 : i32
    %0 = arith.muli %arg0, %c1_i32 : i32
    %1 = arith.addi %0, %arg1 : i32
    %c0_i32 = arith.constant 0 : i32
    %c0_i32_0 = arith.constant 0 : i32
    return %1, %c0_i32 : i32, i32
  }
  func.func @transform_3(%arg0: i32, %arg1: i32) -> (i32, i32, i32) {
    %c0_i32 = arith.constant 0 : i32
    %c0_i32_0 = arith.constant 0 : i32
    %c0_i32_1 = arith.constant 0 : i32
    return %arg0, %c0_i32, %c0_i32_0 : i32, i32, i32
  }
  func.func @transform_4(%arg0: i32, %arg1: i32) -> (i32, i32, i32) {
    %c0_i32 = arith.constant 0 : i32
    %c0_i32_0 = arith.constant 0 : i32
    %c0_i32_1 = arith.constant 0 : i32
    return %arg0, %c0_i32, %c0_i32_0 : i32, i32, i32
  }
}

</mosaic_0001>

<bundles_post_ra>
// kernel: tpu_custom_call.1
= control target key start
LH: loop header
LB: loop body
LE: loop exit
PB: predicated region body
PF: predicated region fallthrough
CT: control target
= control target key end

     0   :  { %10 = vsyncpa [#allocation3], 0  ;;  %vm52_vm0 = vcmask 64512   ;;  %s405_s0 = inlined_call_operand.vmem [shape: f32[32,8], index: 0, kind: input, shape index: {}]   ;;  %s406_s1 = inlined_call_operand.vmem [shape: f32[8,64], index: 1, kind: input, shape index: {}]   ;;  %s407_s2 = inlined_call_operand.hbm [shape: f32[32,64], index: 2, kind: output, shape index: {0}]   ;;  %s408_s3 = inlined_call_operand.hbm [shape: f32[1,1,64], index: 3, kind: output, shape index: {1}]   ;;  %s409_s4 = inlined_call_operand.hbm [shape: f32[1,1,64], index: 4, kind: output, shape index: {2}]  }
   0x1   :  { %v51_v0 = vld [vmem:[%s406_s1] sm:$0xff]  ;;  %v49_v2 = vld [vmem:[%s405_s0 + $0x10] sm:$0xff]  ;;  %v48_v3 = vld [vmem:[%s405_s0 + $0x8] sm:$0xff] }
   0x2   :  { %v47_v1 = vld [vmem:[%s405_s0] sm:$0xff]  ;;  %254 = vmatprep.subr.mxu0 %v51_v0  ;;  %262 = vmatprep.subr.mxu1 %v51_v0  ;;  %v50_v4 = vld [vmem:[%s405_s0 + $0x18] sm:$0xff] }
   0x3   :  { %11 = vsyncpa [#allocation5], 0  ;;  %255 = vmatpush3.msra.mxu0 %v51_v0  ;;  %263 = vmatpush3.msra.mxu1 %v51_v0  ;;  %vm44_vm1 = vcmask 516096   ;;  %v334_v5 = vmov 0.0   ;;  %s335_s1 = smov [#allocation2]   ;;  %vm150_vm2 = vcmask 523264  }
   0x4   :  { %256 = vmatprep.mubr.msk.f32.mxu0 %vm52_vm0, %v47_v1  ;;  %259 = vmatprep.mubr.msk.f32.mxu1 %vm52_vm0, %v49_v2  ;;  %45 = vst.msk [vmem:[#allocation4] sm:$0x1] %vm44_vm1, %v334_v5  ;;  %46 = vst.msk [vmem:[#allocation6] sm:$0x1] %vm44_vm1, %v334_v5  ;;  %s201_s25 = sshll.u32 %s335_s1, 4  ;;  %s202_s25 = int_to_ptr.vmem [resolvable:$true] %s201_s25 }
   0x5   :  { %257 = vmatmul.mubr.msk.f32.vlgmr.msra.gmra.mxu0 %vm52_vm0, %v48_v3  ;;  %260 = vmatmul.mubr.msk.f32.vlgmr.msra.gmra.mxu1 %vm52_vm0, %v50_v4  ;;  %s270_s0 = scalar_lea.vmem %s202_s25, 512  ;;  %p275_p1 = scmp.lt.s32.totalorder %s202_s25, %s202_s25 }
   0x6   :  { %p271_p0 = scmp.ne.s32.totalorder %s202_s25, %s270_s0  ;;  %p276_p2 = scmp.lt.s32.totalorder %s270_s0, %s270_s0 }
   0x8   :  { %p277_p3 = por %p276_p2, %p275_p1 }
   0xa   :  { %p278_p4 = pnand %p277_p3, %p271_p0 }
  0xc5   :  { %v258_v6 = vpop.f32.mrf.mxu0  ;;  %v261_v7 = vpop.f32.mrf.mxu1 }
  0xc6   :  { %152 = vst.msk [vmem:[#allocation2 + $0x8] sm:$0xff] %vm150_vm2, %v258_v6  ;;  %v174_v8 = vmul.f32 %v258_v6, %v258_v6  ;;  %154 = vst.msk [vmem:[#allocation2 + $0x18] sm:$0xff] %vm150_vm2, %v261_v7  ;;  %v157_v11 = vsel %vm150_vm2, %v258_v6, 0.0 }
  0xc7   :  { %v131_v9 = vpop.f32.mrf.mxu0  ;;  %v141_v10 = vpop.f32.mrf.mxu1 }
  0xc8   :  { %151 = vst.msk [vmem:[#allocation2] sm:$0xff] %vm150_vm2, %v131_v9  ;;  %v156_v12 = vsel %vm150_vm2, %v131_v9, 0.0  ;;  %v173_v13 = vmul.f32 %v131_v9, %v131_v9  ;;  %153 = vst.msk [vmem:[#allocation2 + $0x10] sm:$0xff] %vm150_vm2, %v141_v10  ;;  %v175_v15 = vmul.f32 %v141_v10, %v141_v10 }
  0xc9   :  { %v158_v14 = vadd.f32 %v157_v11, %v156_v12 }
  0xca   :  { %281 = shalt.err (!%p278_p4)
}
  0xcb   :  { %s336_s26 = smov 128   ;;  %s337_s27 = smov 8   ;;  %v178_v16 = vsel %vm150_vm2, %v174_v8, 0.0  ;;  %v176_v17 = vmul.f32 %v261_v7, %v261_v7  ;;  %v177_v18 = vsel %vm150_vm2, %v173_v13, 0.0  ;;  %v159_v19 = vsel %vm150_vm2, %v141_v10, 0.0 }
  0xcc   :  { %207 = dma.vmem_to_hbm [thread:$0]  %s202_s25, 512, %s407_s2, [#allocation3], %s336_s26, %s336_s26, %s337_s27   ;;  %v179_v20 = vadd.f32 %v178_v16, %v177_v18  ;;  %v160_v21 = vadd.f32 %v159_v19, %v158_v14  ;;  %v161_v22 = vsel %vm150_vm2, %v261_v7, 0.0  ;;  %v180_v23 = vsel %vm150_vm2, %v175_v15, 0.0  ;;  %v155_v37 = vld [vmem:[#allocation4] sm:$0x1] }
  0xcd   :  { %v182_v26 = vsel %vm150_vm2, %v176_v17, 0.0  ;;  %s338_s2 = smov [#allocation4]   ;;  %v172_v40 = vld [vmem:[#allocation6] sm:$0x1]  ;;  %s339_s5 = smov [#allocation6]  }
  0xce   :  { %v162_v24 = vadd.f32 %v161_v22, %v160_v21  ;;  %v181_v25 = vadd.f32 %v180_v23, %v179_v20  ;;  %s214_s30 = sshll.u32 %s338_s2, 4  ;;  %s224_s6 = sshll.u32 %s339_s5, 4  ;;  %s215_s30 = int_to_ptr.vmem [resolvable:$true] %s214_s30  ;;  %s225_s6 = int_to_ptr.vmem [resolvable:$true] %s224_s6 }
  0xcf   :  { %s290_s7 = scalar_lea.vmem %s215_s30, 16  ;;  %s294_s8 = scalar_lea.vmem %s215_s30, 32 }
  0xd0   :  { %v163_v27 = vrot.slane %v162_v24, 4  ;;  %v183_v28 = vadd.f32 %v182_v26, %v181_v25  ;;  %p291_p5 = scmp.ne.s32.totalorder %s215_s30, %s290_s7  ;;  %p295_p6 = scmp.lt.s32.totalorder %s215_s30, %s215_s30 }
  0xd1   :  { %p296_p7 = scmp.lt.s32.totalorder %s294_s8, %s290_s7 }
  0xd2   :  { %v164_v29 = vadd.f32 %v163_v27, %v162_v24  ;;  %v184_v30 = vrot.slane %v183_v28, 4 }
  0xd3   :  { %p297_p8 = por %p296_p7, %p295_p6 }
  0xd4   :  { %v165_v31 = vrot.slane %v164_v29, 2  ;;  %v185_v32 = vadd.f32 %v184_v30, %v183_v28 }
  0xd5   :  { %p298_p9 = pnand %p297_p8, %p291_p5 }
  0xd6   :  { %v166_v33 = vadd.f32 %v165_v31, %v164_v29  ;;  %v186_v34 = vrot.slane %v185_v32, 2 }
  0xd8   :  { %v167_v35 = vrot.slane %v166_v33, 1  ;;  %v187_v36 = vadd.f32 %v186_v34, %v185_v32 }
  0xda   :  { %v168_v38 = vadd.f32 %v167_v35, %v166_v33  ;;  %v188_v39 = vrot.slane %v187_v36, 1 }
  0xdc   :  { %v169_v41 = vadd.f32 %v168_v38, %v155_v37  ;;  %v189_v42 = vadd.f32 %v188_v39, %v187_v36 }
  0xde   :  { %171 = vst.msk [vmem:[#allocation4] sm:$0x1] %vm44_vm1, %v169_v41  ;;  %v190_v43 = vadd.f32 %v189_v42, %v172_v40 }
  0xdf   :  { %301 = shalt.err (!%p298_p9)
}
  0xe0   :  { %217 = dma.vmem_to_hbm [thread:$0]  %s215_s30, 16, %s408_s3, [#allocation5]   ;;  %191 = vst.msk [vmem:[#allocation6] sm:$0x1] %vm44_vm1, %v190_v43 }
  0xe1   :  { %s310_s11 = scalar_lea.vmem %s225_s6, 16  ;;  %s314_s12 = scalar_lea.vmem %s225_s6, 32 }
  0xe2   :  { %p311_p10 = scmp.ne.s32.totalorder %s225_s6, %s310_s11  ;;  %p315_p11 = scmp.lt.s32.totalorder %s225_s6, %s225_s6 }
  0xe3   :  { %p316_p12 = scmp.lt.s32.totalorder %s314_s12, %s310_s11 }
  0xe5   :  { %p317_p13 = por %p316_p12, %p315_p11 }
  0xe7   :  { %p318_p0 = pnand %p317_p13, %p311_p10 }
  0xe9   :  { %321 = shalt.err (!%p318_p0)
}
  0xea   :  { %227 = dma.vmem_to_hbm [thread:$0]  %s225_s6, 16, %s409_s4, [#allocation5]  }
  0xeb   :  { %330 = dma.done.wait [#allocation3], 512  }
  0xec   :  { %331 = vsyncadd [#allocation3], 4294966784 }
  0xed   :  { %332 = dma.done.wait [#allocation5], 32  }
  0xee   :  { %333 = vsyncadd [#allocation5], 4294967264 }
  0xef   :  { %237 = vsyncpa [#allocation3], 1 }
  0xf0   :  { %238 = vsyncpa [#allocation5], 1 }

</bundles_post_ra>
